<compile_context>
chip_gen: v7x
topology: tpu7x:2x2x1
jax: 0.10.0
libtpu: 0.0.40
codegen_flags: <defaults>
</compile_context>

<pallas_src>
import jax
import jax.numpy as jnp
import numpy as np
from jax.experimental import pallas as pl
from jax.experimental.pallas import tpu as pltpu

_PACK = 128  # packed output width per batch row (lane-dense, multiple of 128)


# ---------------------------------------------------------------------------
# Pallas kernels
# ---------------------------------------------------------------------------
def _st_fused_kernel(x_ref, wct_ref, bc_ref, wa_ref, wq_ref, bq_ref, out_ref):
    """Fused ST image branch, whole batch per invocation.

    x_ref   : (C, B*N)   bf16  input, batch folded into the lane axis
    wct_ref : (D, C)     bf16  1x1-conv weight (pre-transposed)
    bc_ref  : (D, 1)     f32   conv bias (column)
    wa_ref  : (D, 1, 1)  f32   spatial-attention scoring vector
    wq_ref  : (1, D)     f32   quality-head weight (row)
    bq_ref  : (1, 1)     f32   quality-head bias (SMEM scalar)
    out_ref : (B, 128)   f32   packed [pooled(D) | score | reg | zeros]
    """
    B, P = out_ref.shape
    D = wct_ref.shape[0]
    N = x_ref.shape[1] // B

    # 1x1 conv (+ReLU) as ONE lane-dense (D,C)x(C,B*N) MXU contraction,
    # bf16 operands with f32 accumulation.  feat never leaves VMEM.
    feat = jnp.dot(wct_ref[...], x_ref[...], preferred_element_type=jnp.float32)
    feat = jnp.maximum(feat + bc_ref[...], 0.0)               # (D, B*N) f32

    feat3 = feat.reshape(D, B, N)                             # (D, B, N)

    # Spatial-attention logits: VPU multiply + leading-axis reduce
    # (avoids an M=1 MXU matmul).
    logits = jnp.sum(feat3 * wa_ref[...], axis=0)             # (B, N) f32

    # Softmax over the spatial axis (float32, exact reciprocal).
    m = jnp.max(logits, axis=-1, keepdims=True)
    e = jnp.exp(logits - m)
    denom = jnp.sum(e, axis=-1, keepdims=True)
    attn = e * pl.reciprocal(denom)                           # (B, N)

    # Attention regularizer.
    reg = jnp.sum(attn * attn, axis=-1, keepdims=True)        # (B, 1)

    # Attention pooling: VPU multiply + lane reduce, then a tiny (D,B)->(B,D)
    # XLU transpose instead of an M=1 MXU matmul.
    pooled = jnp.sum(feat3 * attn[None, :, :], axis=-1).T     # (B, D)

    # Quality head; bias comes through SMEM as a true scalar.
    score = jnp.sum(pooled * wq_ref[...], axis=-1, keepdims=True) + bq_ref[0, 0]

    # ONE full-width, lane-dense 128-lane store (no masked partial stores).
    parts = [pooled, score, reg]
    pad_w = P - D - 2
    if pad_w > 0:
        parts.append(jnp.zeros((B, pad_w), jnp.float32))
    out_ref[...] = jnp.concatenate(parts, axis=-1)


def _linear_kernel(x_ref, w_ref, b_ref, o_ref):
    o_ref[...] = jnp.dot(x_ref[...], w_ref[...],
                         preferred_element_type=jnp.float32) + b_ref[...]


# ---------------------------------------------------------------------------
# pallas_call wrappers
# ---------------------------------------------------------------------------
def st_image_branch(params, x_nchw):
    """Fused image branch: returns (image_feature, score, reg)."""
    B, C, H, W = x_nchw.shape
    N = H * W
    D = params["w_conv_t"].shape[0]
    assert D + 2 <= _PACK  # TODO(synk): tile the packed output for D > 126

    # Fold batch into the lane axis: (B,C,H,W) -> (C, B*N).  Tiny one-time XLA
    # transpose; lets the conv run as a single lane-dense contraction.
    x_flat = jnp.transpose(x_nchw.reshape(B, C, N), (1, 0, 2)).reshape(C, B * N)

    # bf16 MXU operands (halves the x DMA bytes); accumulation stays f32.
    x_bf = x_flat.astype(jnp.bfloat16)
    w_bf = params["w_conv_t"].astype(jnp.bfloat16)

    vmem = pl.BlockSpec(memory_space=pltpu.MemorySpace.VMEM)
    smem = pl.BlockSpec(memory_space=pltpu.MemorySpace.SMEM)

    packed = pl.pallas_call(
        _st_fused_kernel,
        out_shape=jax.ShapeDtypeStruct((B, _PACK), jnp.float32),
        in_specs=[vmem, vmem, vmem, vmem, vmem, smem],
        out_specs=vmem,
    )(x_bf, w_bf, params["b_conv"],
      params["w_att"].reshape(D, 1, 1), params["w_q"], params["b_q"])

    image_feature = packed[:, :D]
    score = packed[:, D:D + 1]
    reg = packed[:, D + 1:D + 2]
    return image_feature, score, reg


def feature_model(params, x2d):
    """2-D branch: linear F_in -> D, no grid, whole arrays resident in VMEM."""
    M = x2d.shape[0]
    D = params["w_f"].shape[1]
    vmem = pl.BlockSpec(memory_space=pltpu.MemorySpace.VMEM)
    # TODO(synk): for large M, grid over rows with (tm, F_in) blocks, tm % 8 == 0.
    return pl.pallas_call(
        _linear_kernel,
        out_shape=jax.ShapeDtypeStruct((M, D), jnp.float32),
        in_specs=[vmem, vmem, vmem],
        out_specs=vmem,
    )(x2d, params["w_f"], params["b_f"])


# ---------------------------------------------------------------------------
# ST forward
# ---------------------------------------------------------------------------
def _st_forward(params, x):
    if x.ndim > 2:
        # _, image_feature = base_model(x)          (base head is discarded by ST)
        # image_feature, reg = sattention(image_feature)
        # score = quality_model(image_feature)
        return st_image_branch(params, x)
    else:
        return feature_model(params, x)


st_forward = jax.jit(_st_forward)


# ---------------------------------------------------------------------------
# Synthetic parameters + pure-JAX reference for correctness checking
# ---------------------------------------------------------------------------
def init_params(key, c_in=4, d_feat=32, f_in2=8):
    k = jax.random.split(key, 7)
    return {
        "w_conv_t": jax.random.normal(k[0], (d_feat, c_in), jnp.float32) * 0.1,
        "b_conv":   jax.random.normal(k[1], (d_feat, 1), jnp.float32) * 0.01,
        "w_att":    jax.random.normal(k[2], (1, d_feat), jnp.float32) * 0.1,
        "w_q":      jax.random.normal(k[3], (1, d_feat), jnp.float32) * 0.1,
        "b_q":      jax.random.normal(k[4], (1, 1), jnp.float32) * 0.01,
        "w_f":      jax.random.normal(k[5], (f_in2, d_feat), jnp.float32) * 0.1,
        "b_f":      jax.random.normal(k[6], (1, d_feat), jnp.float32) * 0.01,
    }


def _st_image_reference(params, x_nchw):
    B, C, H, W = x_nchw.shape
    hi = jax.lax.Precision.HIGHEST
    # Match the kernel's bf16 MXU operands for the conv.
    xb = x_nchw.reshape(B, C, H * W).astype(jnp.bfloat16).astype(jnp.float32)
    wb = params["w_conv_t"].astype(jnp.bfloat16).astype(jnp.float32)
    feat = jnp.einsum("dc,bcn->bdn", wb, xb, precision=hi) + params["b_conv"][None]
    feat = jnp.maximum(feat, 0.0)                               # (B, D, N)
    logits = jnp.einsum("d,bdn->bn", params["w_att"].reshape(-1), feat,
                        precision=hi)                           # (B, N)
    attn = jax.nn.softmax(logits, axis=-1)
    pooled = jnp.einsum("bn,bdn->bd", attn, feat, precision=hi)  # (B, D)
    score = jnp.sum(pooled * params["w_q"], axis=-1, keepdims=True) + params["b_q"]
    reg = jnp.sum(attn * attn, axis=-1, keepdims=True)
    return pooled, score, reg


# ---------------------------------------------------------------------------
if __name__ == "__main__":
    key = jax.random.PRNGKey(0)
    kx, kx2, kp = jax.random.split(key, 3)

    params = init_params(kp, c_in=4, d_feat=32, f_in2=8)

    # image branch: NCHW (B, C, H, W) = (2, 4, 16, 16), like PyTorch
    x = jax.random.normal(kx, (2, 4, 16, 16), jnp.float32)
    image_feature, score, reg = st_forward(params, x)
    jax.block_until_ready((image_feature, score, reg))
    assert image_feature.shape == (2, 32)
    assert score.shape == (2, 1)
    assert reg.shape == (2, 1)

    # numerics vs pure-JAX reference (exact reciprocal + matched bf16 operands)
    ref_feat, ref_score, ref_reg = _st_image_reference(params, x)
    np.testing.assert_allclose(np.asarray(image_feature), np.asarray(ref_feat),
                               rtol=2e-3, atol=2e-3)
    np.testing.assert_allclose(np.asarray(score), np.asarray(ref_score),
                               rtol=2e-3, atol=2e-3)
    np.testing.assert_allclose(np.asarray(reg), np.asarray(ref_reg),
                               rtol=2e-3, atol=2e-3)

    # 2-D branch: feature_model
    x2 = jax.random.normal(kx2, (2, 8), jnp.float32)
    feat2 = st_forward(params, x2)
    jax.block_until_ready(feat2)
    assert feat2.shape == (2, 32)
    ref2 = jnp.dot(x2, params["w_f"],
                   precision=jax.lax.Precision.HIGHEST) + params["b_f"]
    np.testing.assert_allclose(np.asarray(feat2), np.asarray(ref2),
                               rtol=1e-2, atol=1e-2)

    print("KERNEL_OK")
</pallas_src>

<mosaic_0001>
module attributes {stable_mosaic.version = 11 : i64} {
  func.func @_st_fused_kernel(%arg0: memref<4x512xbf16, #tpu.memory_space<vmem>>, %arg1: memref<32x4xbf16, #tpu.memory_space<vmem>>, %arg2: memref<32x1xf32, #tpu.memory_space<vmem>>, %arg3: memref<32x1x1xf32, #tpu.memory_space<vmem>>, %arg4: memref<1x32xf32, #tpu.memory_space<vmem>>, %arg5: memref<1x1xf32, #tpu.memory_space<smem>>, %arg6: memref<2x128xf32, #tpu.memory_space<vmem>>) attributes {dimension_semantics = [], scalar_prefetch = 0 : i64, scratch_operands = 0 : i64, tpu.core_type = #tpu.core_type<tc>} {
    %c0 = arith.constant 0 : index
    %c0_0 = arith.constant 0 : index
    %0 = vector.load %arg1[%c0, %c0_0] : memref<32x4xbf16, #tpu.memory_space<vmem>>, vector<32x4xbf16>
    %c0_1 = arith.constant 0 : index
    %c0_2 = arith.constant 0 : index
    %1 = vector.load %arg0[%c0_1, %c0_2] : memref<4x512xbf16, #tpu.memory_space<vmem>>, vector<4x512xbf16>
    %cst = arith.constant dense<0.000000e+00> : vector<32x512xf32>
    %2 = tpu.matmul %0, %1, %cst {dimension_numbers = #tpu.dot_dimension_numbers<[1], [0], [0], [1], [0, 0, 1, 1], [], []>} : vector<32x4xbf16>, vector<4x512xbf16>, vector<32x512xf32> -> vector<32x512xf32>
    %c0_3 = arith.constant 0 : index
    %c0_4 = arith.constant 0 : index
    %3 = vector.load %arg2[%c0_3, %c0_4] : memref<32x1xf32, #tpu.memory_space<vmem>>, vector<32x1xf32>
    %4 = vector.broadcast %3 : vector<32x1xf32> to vector<32x512xf32>
    %5 = arith.addf %2, %4 : vector<32x512xf32>
    %cst_5 = arith.constant 0.000000e+00 : f32
    %6 = vector.broadcast %cst_5 : f32 to vector<32x512xf32>
    %7 = arith.maximumf %5, %6 : vector<32x512xf32>
    %8 = vector.shape_cast %7 : vector<32x512xf32> to vector<32x2x256xf32>
    %c0_6 = arith.constant 0 : index
    %c0_7 = arith.constant 0 : index
    %c0_8 = arith.constant 0 : index
    %9 = vector.load %arg3[%c0_6, %c0_7, %c0_8] : memref<32x1x1xf32, #tpu.memory_space<vmem>>, vector<32x1x1xf32>
    %10 = vector.broadcast %9 : vector<32x1x1xf32> to vector<32x2x256xf32>
    %11 = arith.mulf %8, %10 : vector<32x2x256xf32>
    %cst_9 = arith.constant dense<0.000000e+00> : vector<2x256xf32>
    %12 = vector.multi_reduction <add>, %11, %cst_9 [0] : vector<32x2x256xf32> to vector<2x256xf32>
    %cst_10 = arith.constant dense<0xFF800000> : vector<2xf32>
    %13 = vector.multi_reduction <maximumf>, %12, %cst_10 [1] : vector<2x256xf32> to vector<2xf32>
    %14 = vector.shape_cast %13 : vector<2xf32> to vector<2x1xf32>
    %15 = vector.broadcast %14 : vector<2x1xf32> to vector<2x256xf32>
    %16 = arith.subf %12, %15 : vector<2x256xf32>
    %17 = math.exp %16 : vector<2x256xf32>
    %cst_11 = arith.constant dense<0.000000e+00> : vector<2xf32>
    %18 = vector.multi_reduction <add>, %17, %cst_11 [1] : vector<2x256xf32> to vector<2xf32>
    %19 = vector.shape_cast %18 : vector<2xf32> to vector<2x1xf32>
    %20 = tpu.reciprocal %19 : vector<2x1xf32> -> vector<2x1xf32>
    %21 = vector.broadcast %20 : vector<2x1xf32> to vector<2x256xf32>
    %22 = arith.mulf %17, %21 : vector<2x256xf32>
    %23 = arith.mulf %22, %22 : vector<2x256xf32>
    %cst_12 = arith.constant dense<0.000000e+00> : vector<2xf32>
    %24 = vector.multi_reduction <add>, %23, %cst_12 [1] : vector<2x256xf32> to vector<2xf32>
    %25 = vector.shape_cast %24 : vector<2xf32> to vector<2x1xf32>
    %26 = vector.shape_cast %22 : vector<2x256xf32> to vector<1x2x256xf32>
    %27 = vector.broadcast %26 : vector<1x2x256xf32> to vector<32x2x256xf32>
    %28 = arith.mulf %8, %27 : vector<32x2x256xf32>
    %cst_13 = arith.constant dense<0.000000e+00> : vector<32x2xf32>
    %29 = vector.multi_reduction <add>, %28, %cst_13 [2] : vector<32x2x256xf32> to vector<32x2xf32>
    %30 = tpu.transpose %29, [1, 0] : vector<32x2xf32> -> vector<2x32xf32>
    %c0_14 = arith.constant 0 : index
    %c0_15 = arith.constant 0 : index
    %31 = vector.load %arg4[%c0_14, %c0_15] : memref<1x32xf32, #tpu.memory_space<vmem>>, vector<1x32xf32>
    %32 = vector.broadcast %31 : vector<1x32xf32> to vector<2x32xf32>
    %33 = arith.mulf %30, %32 : vector<2x32xf32>
    %cst_16 = arith.constant dense<0.000000e+00> : vector<2xf32>
    %34 = vector.multi_reduction <add>, %33, %cst_16 [1] : vector<2x32xf32> to vector<2xf32>
    %35 = vector.shape_cast %34 : vector<2xf32> to vector<2x1xf32>
    %c0_17 = arith.constant 0 : index
    %c0_18 = arith.constant 0 : index
    %36 = memref.load %arg5[%c0_17, %c0_18] : memref<1x1xf32, #tpu.memory_space<smem>>
    %37 = vector.broadcast %36 : f32 to vector<2x1xf32>
    %38 = arith.addf %35, %37 : vector<2x1xf32>
    %cst_19 = arith.constant 0.000000e+00 : f32
    %39 = vector.broadcast %cst_19 : f32 to vector<2x94xf32>
    %40 = tpu.concatenate %30, %38, %25, %39 in 1 : vector<2x32xf32>, vector<2x1xf32>, vector<2x1xf32>, vector<2x94xf32> -> vector<2x128xf32>
    %c0_20 = arith.constant 0 : index
    %c0_21 = arith.constant 0 : index
    %41 = vector.load %arg6[%c0_20, %c0_21] : memref<2x128xf32, #tpu.memory_space<vmem>>, vector<2x128xf32>
    tpu.vector_store %arg6[%c0_20, %c0_21], %40 {strides = array<i32>} : memref<2x128xf32, #tpu.memory_space<vmem>>, vector<2x128xf32>,
    return
  }
}

</mosaic_0001>

<bundles_post_ra>
// kernel: _st_forward.1
= control target key start
LH: loop header
LB: loop body
LE: loop exit
PB: predicated region body
PF: predicated region fallthrough
CT: control target
= control target key end

     0   :  { %v2799_v0 = vlaneseq  ;;  %v1827_v2 = vmov 1983009808   ;;  %v1828_v4 = vmov 0   ;;  %vm89_vm0 = vcmask 1041408   ;;  %s2792_s0 = inlined_call_operand.vmem [shape: bf16[4,512], index: 0, kind: input, shape index: {}]   ;;  %s2793_s1 = inlined_call_operand.vmem [shape: bf16[32,4], index: 1, kind: input, shape index: {}]   ;;  %s2794_s2 = inlined_call_operand.vmem [shape: f32[32,1], index: 2, kind: input, shape index: {}]   ;;  %s2795_s3 = inlined_call_operand.vmem [shape: f32[32,1,1], index: 3, kind: input, shape index: {}]   ;;  %s2796_s4 = inlined_call_operand.vmem [shape: f32[1,32], index: 4, kind: input, shape index: {}]   ;;  %s2797_s5 = inlined_call_operand.<no memory space> [shape: f32[1,1], index: 5, kind: input, shape index: {}]   ;;  %s2798_s6 = inlined_call_operand.vmem [shape: f32[2,128], index: 6, kind: output, shape index: {}]  }
   0x1   :  { %v29_v1 = vld [vmem:[%s2792_s0] sm:$0xff]  ;;  %v67_v3 = vunpack.c.l.s4 %v1827_v2  ;;  %134 = vmatprep.mubr.bf16.mxu0 %v1828_v4  ;;  %187 = vmatprep.mubr.bf16.mxu1 %v1828_v4  ;;  %v31_v19 = vld [vmem:[%s2794_s2 + $0x8] sm:$0xff]  ;;  %vm82_vm1 = vcmask 31744   ;;  %v32_v30 = vld [vmem:[%s2794_s2 + $0x10] sm:$0xff]  ;;  %v1829_v60 = vmov 1934713408  }
   0x2   :  { %v1870_v5 = vshrl.u32 %v2799_v0, 7  ;;  %1816 = vset.pattern.permute.xlu0 %v1828_v4  ;;  %1817 = vset.pattern.permute.xlu1 %v1828_v4  ;;  %v65_v7 = vcombine.high %v29_v1, %v29_v1  ;;  %v30_v8 = vld [vmem:[%s2794_s2] sm:$0xff]  ;;  %v1820_v26 = vld [vmem:[%s2793_s1 + $0x8] sm:$0xff]   ;;  %v1795_v36 = vld [vmem:[%s2795_s3 + $0x10] ss:$0 sm:$0xff]  ;;  %v257_v61 = vunpack.c.l.s4 %v1829_v60  ;;  %vm1674_vm2 = vcmask 1041409  }
   0x3   :  { %v68_v6 = vunpack.c.0.s8 %v67_v3  ;;  %v1780_v9 = vld [vmem:[%s2795_s3 + $0x1] ss:$0 sm:$0xff]  ;;  %36 = vperm.xlu0 %1816, %v30_v8   ;;  %v1779_v11 = vld [vmem:[%s2795_s3] ss:$0 sm:$0xff]  ;;  %v1781_v12 = vld [vmem:[%s2795_s3 + $0x2] ss:$0 sm:$0xff] }
   0x4   :  { %2826 = vst [vmem:[#allocation3_spill] sm:$0xff] %v1870_v5  ;;  %949 = vperm.xlu1 %1817, %v1780_v9   ;;  %v1782_v20 = vld [vmem:[%s2795_s3 + $0x3] ss:$0 sm:$0xff]  ;;  %v1783_v22 = vld [vmem:[%s2795_s3 + $0x4] ss:$0 sm:$0xff]  ;;  %v33_v39 = vld [vmem:[%s2794_s2 + $0x18] sm:$0xff]  ;;  %v258_v3 = vunpack.c.0.s8 %v257_v61 }
   0x5   :  { %v1879_v10 = vsub.s32 %v68_v6, %v1870_v5  ;;  %v1819_v21 = vld [vmem:[%s2793_s1] sm:$0xff]   ;;  %v1787_v27 = vld [vmem:[%s2795_s3 + $0x8] ss:$0 sm:$0xff]  ;;  %v1788_v28 = vld [vmem:[%s2795_s3 + $0x9] ss:$0 sm:$0xff]  ;;  %vm1676_vm3 = vcmask 1042434  }
   0x6   :  { %v1784_v23 = vld [vmem:[%s2795_s3 + $0x5] ss:$0 sm:$0xff]  ;;  %v1785_v24 = vld [vmem:[%s2795_s3 + $0x6] ss:$0 sm:$0xff]  ;;  %v1786_v25 = vld [vmem:[%s2795_s3 + $0x7] ss:$0 sm:$0xff] }
   0x7   :  { %v72_v13 = vrot.slane %v29_v1, %v1879_v10  ;;  %v79_v14 = vrot.slane %v65_v7, %v1879_v10  ;;  %945 = vperm.xlu0 %1816, %v1779_v11   ;;  %v1789_v29 = vld [vmem:[%s2795_s3 + $0xa] ss:$0 sm:$0xff]  ;;  %v1790_v31 = vld [vmem:[%s2795_s3 + $0xb] ss:$0 sm:$0xff]  ;;  %v1791_v32 = vld [vmem:[%s2795_s3 + $0xc] ss:$0 sm:$0xff] }
   0x8   :  { %953 = vperm.xlu1 %1817, %v1781_v12   ;;  %v1792_v33 = vld [vmem:[%s2795_s3 + $0xd] ss:$0 sm:$0xff]  ;;  %v1793_v34 = vld [vmem:[%s2795_s3 + $0xe] ss:$0 sm:$0xff]  ;;  %v1794_v35 = vld [vmem:[%s2795_s3 + $0xf] ss:$0 sm:$0xff] }
   0x9   :  { %v80_v15 = vcombine.high %v72_v13, %v72_v13  ;;  %v81_v16 = vcombine.high %v79_v14, %v79_v14  ;;  %v91_v17 = vsel %vm89_vm0, %v72_v13, 0  ;;  %v97_v18 = vsel %vm89_vm0, %v79_v14, 0  ;;  %v1796_v37 = vld [vmem:[%s2795_s3 + $0x11] ss:$0 sm:$0xff]  ;;  %v1797_v38 = vld [vmem:[%s2795_s3 + $0x12] ss:$0 sm:$0xff] }
   0xa   :  { %v1798_v40 = vld [vmem:[%s2795_s3 + $0x13] ss:$0 sm:$0xff]  ;;  %v1799_v41 = vld [vmem:[%s2795_s3 + $0x14] ss:$0 sm:$0xff]  ;;  %v1800_v42 = vld [vmem:[%s2795_s3 + $0x15] ss:$0 sm:$0xff] }
   0xb   :  { %1773 = vmatprep.subr.msk.bf16.mxu0 %vm89_vm0, %v80_v15  ;;  %1776 = vmatprep.subr.msk.bf16.mxu1 %vm89_vm0, %v81_v16  ;;  %v1801_v43 = vld [vmem:[%s2795_s3 + $0x16] ss:$0 sm:$0xff]  ;;  %v1802_v44 = vld [vmem:[%s2795_s3 + $0x17] ss:$0 sm:$0xff]  ;;  %v1803_v45 = vld [vmem:[%s2795_s3 + $0x18] ss:$0 sm:$0xff] }
   0xc   :  { %103 = vmatpush1.bf16.msra.mxu0 %v91_v17  ;;  %156 = vmatpush1.bf16.msra.mxu1 %v97_v18  ;;  %v1804_v46 = vld [vmem:[%s2795_s3 + $0x19] ss:$0 sm:$0xff]  ;;  %v1805_v47 = vld [vmem:[%s2795_s3 + $0x1a] ss:$0 sm:$0xff]  ;;  %v1806_v48 = vld [vmem:[%s2795_s3 + $0x1b] ss:$0 sm:$0xff]  ;;  %v2016_v18 = vsub.s32 %v258_v3, %v1870_v5 }
   0xd   :  { %41 = vperm.xlu0 %1816, %v31_v19   ;;  %957 = vperm.xlu1 %1817, %v1782_v20   ;;  %v1807_v49 = vld [vmem:[%s2795_s3 + $0x1c] ss:$0 sm:$0xff]  ;;  %v1808_v50 = vld [vmem:[%s2795_s3 + $0x1d] ss:$0 sm:$0xff]  ;;  %v1809_v51 = vld [vmem:[%s2795_s3 + $0x1e] ss:$0 sm:$0xff] }
   0xe   :  { %v1810_v52 = vld [vmem:[%s2795_s3 + $0x1f] ss:$0 sm:$0xff]  ;;  %vm1678_vm4 = vcmask 1043459   ;;  %vm1680_vm5 = vcmask 1044484   ;;  %vm1682_vm6 = vcmask 1045509   ;;  %vm1684_vm7 = vcmask 1046534  }
   0xf   :  { %1774 = vmatmul.mubr.msk.bf16.vlgmr.msra.gmra.mrb[0].mxu0 %vm82_vm1, %v1819_v21  ;;  %1777 = vmatmul.mubr.msk.bf16.vlgmr.msra.gmra.mrb[0].mxu1 %vm82_vm1, %v1819_v21  ;;  %vm1686_vm8 = vcmask 1047559   ;;  %vm1753_vm9 = vcmask 254976   ;;  %vm1760_vm10 = vcmask 261120   ;;  %vm1762_vm11 = vcmask 269312  }
  0x10   :  { %144 = vmatprep.mubr.bf16.mxu0 %v1828_v4  ;;  %197 = vmatprep.mubr.bf16.mxu1 %v1828_v4  ;;  %vm1764_vm12 = vcmask 277504  }
  0x11   :  { %961 = vperm.xlu0 %1816, %v1783_v22   ;;  %965 = vperm.xlu1 %1817, %v1784_v23   ;;  %v2803_v22 = vmov 0.0  }
  0x15   :  { %969 = vperm.xlu0 %1816, %v1785_v24   ;;  %973 = vperm.xlu1 %1817, %v1786_v25  }
  0x17   :  { %1775 = vmatmul.mubr.msk.bf16.gmra.mrb[4].mxu0 %vm82_vm1, %v1820_v26  ;;  %1778 = vmatmul.mubr.msk.bf16.gmra.mrb[4].mxu1 %vm82_vm1, %v1820_v26 }
  0x19   :  { %977 = vperm.xlu0 %1816, %v1787_v27   ;;  %981 = vperm.xlu1 %1817, %v1788_v28  }
  0x1d   :  { %985 = vperm.xlu0 %1816, %v1789_v29   ;;  %46 = vperm.xlu1 %1817, %v32_v30  }
  0x21   :  { %989 = vperm.xlu0 %1816, %v1790_v31   ;;  %993 = vperm.xlu1 %1817, %v1791_v32  }
  0x25   :  { %997 = vperm.xlu0 %1816, %v1792_v33   ;;  %1001 = vperm.xlu1 %1817, %v1793_v34  }
  0x29   :  { %1005 = vperm.xlu0 %1816, %v1794_v35   ;;  %1009 = vperm.xlu1 %1817, %v1795_v36  }
  0x2d   :  { %1013 = vperm.xlu0 %1816, %v1796_v37   ;;  %1017 = vperm.xlu1 %1817, %v1797_v38  }
  0x31   :  { %51 = vperm.xlu0 %1816, %v33_v39   ;;  %1021 = vperm.xlu1 %1817, %v1798_v40  }
  0x35   :  { %1025 = vperm.xlu0 %1816, %v1799_v41   ;;  %1029 = vperm.xlu1 %1817, %v1800_v42  }
  0x39   :  { %1033 = vperm.xlu0 %1816, %v1801_v43   ;;  %1037 = vperm.xlu1 %1817, %v1802_v44  }
  0x3d   :  { %1041 = vperm.xlu0 %1816, %v1803_v45   ;;  %1045 = vperm.xlu1 %1817, %v1804_v46  }
  0x41   :  { %1049 = vperm.xlu0 %1816, %v1805_v47   ;;  %1053 = vperm.xlu1 %1817, %v1806_v48  }
  0x45   :  { %1057 = vperm.xlu0 %1816, %v1807_v49   ;;  %1061 = vperm.xlu1 %1817, %v1808_v50  }
  0x49   :  { %1065 = vperm.xlu0 %1816, %v1809_v51   ;;  %1069 = vperm.xlu1 %1817, %v1810_v52  }
  0x82   :  { %v37_v53 = vpop.permute.xlu0 %36 }
  0x83   :  { %v1999_v54 = vpop.permute.xlu1 %949 }
  0x86   :  { %v2001_v55 = vpop.permute.xlu0 %945 }
  0x87   :  { %v2003_v56 = vpop.permute.xlu1 %953 }
  0x8c   :  { %v2005_v57 = vpop.permute.xlu0 %41  ;;  %v2007_v58 = vpop.permute.xlu1 %957 }
  0x90   :  { %v2009_v59 = vpop.permute.xlu0 %961  ;;  %v2011_v62 = vpop.permute.xlu1 %965 }
  0x94   :  { %v2013_v63 = vpop.permute.xlu0 %969  ;;  %v2029_v31 = vpop.permute.xlu1 %973 }
  0x98   :  { %v2031_v32 = vpop.permute.xlu0 %977 }
  0xe2   :  { %v136_v1 = vpop.f32.mrb[0].mxu0  ;;  %v189_v2 = vpop.f32.mrb[0].mxu1 }
  0xe3   :  { %v137_v4 = vadd.f32 %v136_v1, %v37_v53  ;;  %v190_v6 = vadd.f32 %v189_v2, %v37_v53  ;;  %v138_v7 = vpop.f32.mrb[1].mxu0  ;;  %v191_v8 = vpop.f32.mrb[1].mxu1 }
  0xe4   :  { %v139_v9 = vadd.f32 %v138_v7, %v37_v53  ;;  %v192_v11 = vadd.f32 %v191_v8, %v37_v53  ;;  %v140_v12 = vpop.f32.mrb[2].mxu0  ;;  %v193_v13 = vpop.f32.mrb[2].mxu1 }
  0xe5   :  { %v208_v14 = vmax.f32 %v137_v4, 0.0  ;;  %v210_v15 = vmax.f32 %v190_v6, 0.0  ;;  %v142_v16 = vpop.f32.mrb[3].mxu0  ;;  %v195_v17 = vpop.f32.mrb[3].mxu1  ;;  %v2019_v21 = vadd.f32 %v140_v12, %v2005_v57  ;;  %v2055_v52 = vadd.f32 %v193_v13, %v2005_v57 }
  0xe6   :  { %v209_v19 = vmax.f32 %v139_v9, 0.0  ;;  %v211_v20 = vmax.f32 %v192_v11, 0.0 }
  0xe7   :  { %v224_v23 = vcombine.high %v208_v14, %v2803_v22  ;;  %v231_v24 = vrot.slane %v208_v14, %v1879_v10  ;;  %v239_v25 = vcombine.high %v210_v15, %v2803_v22  ;;  %v246_v26 = vrot.slane %v210_v15, %v1879_v10 }
  0xe8   :  { %v488_v27 = vcombine.high %v209_v19, %v2803_v22  ;;  %v495_v28 = vrot.slane %v209_v19, %v1879_v10  ;;  %v503_v29 = vcombine.high %v211_v20, %v2803_v22  ;;  %v510_v30 = vrot.slane %v211_v20, %v1879_v10 }
  0xe9   :  { %v238_v33 = vrot.slane %v224_v23, %v1879_v10  ;;  %v253_v34 = vrot.slane %v239_v25, %v1879_v10  ;;  %v254_v35 = vcombine.low %v231_v24, %v246_v26  ;;  %v255_v36 = vcombine.high %v231_v24, %v246_v26 }
  0xea   :  { %v502_v37 = vrot.slane %v488_v27, %v1879_v10  ;;  %v517_v38 = vrot.slane %v503_v29, %v1879_v10  ;;  %v518_v39 = vcombine.low %v495_v28, %v510_v30  ;;  %v519_v40 = vcombine.high %v495_v28, %v510_v30  ;;  %v2037_v41 = vpop.f32.mrb[4].mxu0  ;;  %v2039_v42 = vpop.f32.mrb[4].mxu1 }
  0xeb   :  { %v2042_v43 = vrot.slane %v254_v35, %v2016_v18  ;;  %v2045_v44 = vrot.slane %v255_v36, %v2016_v18  ;;  %v270_v45 = vcombine.low %v238_v33, %v253_v34  ;;  %v271_v46 = vcombine.high %v238_v33, %v253_v34  ;;  %v2047_v47 = vpop.f32.mrb[5].mxu0  ;;  %v2049_v48 = vpop.f32.mrb[5].mxu1 }
  0xec   :  { %v2052_v49 = vrot.slane %v518_v39, %v2016_v18  ;;  %v534_v50 = vcombine.low %v502_v37, %v517_v38  ;;  %v535_v51 = vcombine.high %v502_v37, %v517_v38  ;;  %v2057_v53 = vpop.f32.mrb[6].mxu0  ;;  %v2059_v60 = vpop.f32.mrb[6].mxu1  ;;  %v2084_v9 = vrot.slane %v519_v40, %v2016_v18 }
  0xed   :  { %v2062_v61 = vrot.slane %v270_v45, %v2016_v18  ;;  %v2065_v1 = vrot.slane %v271_v46, %v2016_v18  ;;  %v2069_v2 = vcombine.high %v2042_v43, %v2803_v22  ;;  %v2073_v3 = vcombine.high %v2045_v44, %v2803_v22  ;;  %v2075_v4 = vpop.f32.mrb[7].mxu0  ;;  %v2077_v6 = vpop.f32.mrb[7].mxu1 }
  0xee   :  { %v1072_v7 = vmul.f32 %v2001_v55, %v2042_v43  ;;  %v1076_v8 = vmul.f32 %v2003_v56, %v2045_v44  ;;  %v2087_v11 = vrot.slane %v534_v50, %v2016_v18  ;;  %v2104_v20 = vrot.slane %v535_v51, %v2016_v18  ;;  %v2113_v29 = vpop.permute.xlu1 %981 }
  0xef   :  { %v2091_v12 = vcombine.high %v2062_v61, %v2803_v22  ;;  %v2095_v13 = vcombine.high %v2065_v1, %v2803_v22  ;;  %v1074_v14 = vmul.f32 %v1999_v54, %v2069_v2  ;;  %v1078_v15 = vmul.f32 %v2007_v58, %v2073_v3 }
  0xf0   :  { %v1080_v19 = vmul.f32 %v2009_v59, %v2062_v61  ;;  %v143_v23 = vadd.f32 %v142_v16, %v2005_v57  ;;  %v196_v24 = vadd.f32 %v195_v17, %v2005_v57  ;;  %v1084_v25 = vmul.f32 %v2013_v63, %v2065_v1  ;;  %v2123_v17 = vpop.permute.xlu0 %985 }
  0xf1   :  { %2827 = vst [vmem:[#allocation4_spill] sm:$0xff] %v2095_v13  ;;  %v1136_v26 = vsel %vm89_vm0, %v1072_v7, 0.0  ;;  %v1137_v27 = vsel %vm89_vm0, %v1074_v14, 0.0  ;;  %v1139_v28 = vsel %vm89_vm0, %v1076_v8, 0.0  ;;  %v1082_v30 = vmul.f32 %v2011_v62, %v2091_v12 }
  0xf2   :  { %v1086_v33 = vmul.f32 %v2029_v31, %v2095_v13  ;;  %v1138_v16 = vadd.f32 %v1137_v27, %v1136_v26  ;;  %v2121_v57 = vcombine.high %v2052_v49, %v2803_v22  ;;  %v1141_v34 = vsel %vm89_vm0, %v1078_v15, 0.0 }
  0xf3   :  { %v1143_v35 = vsel %vm89_vm0, %v1080_v19, 0.0  ;;  %v2129_v36 = vcombine.high %v2084_v9, %v2803_v22  ;;  %v2133_v37 = vcombine.high %v2087_v11, %v2803_v22  ;;  %v1073_v39 = vmul.f32 %v2001_v55, %v2052_v49  ;;  %v2158_v19 = vpop.permute.xlu1 %46 }
  0xf4   :  { %v1140_v38 = vadd.f32 %v1139_v28, %v1138_v16  ;;  %v1075_v40 = vmul.f32 %v1999_v54, %v2121_v57  ;;  %v1077_v45 = vmul.f32 %v2003_v56, %v2084_v9  ;;  %v1147_v46 = vsel %vm89_vm0, %v1084_v25, 0.0  ;;  %v2163_v28 = vpop.permute.xlu0 %989 }
  0xf5   :  { %v1079_v50 = vmul.f32 %v2007_v58, %v2129_v36  ;;  %v1081_v51 = vmul.f32 %v2009_v59, %v2087_v11  ;;  %v1083_v7 = vmul.f32 %v2011_v62, %v2133_v37  ;;  %v1145_v55 = vsel %vm89_vm0, %v1082_v30, 0.0 }
  0xf6   :  { %v1142_v8 = vadd.f32 %v1141_v34, %v1140_v38  ;;  %v1199_v14 = vsel %vm89_vm0, %v1073_v39, 0.0  ;;  %v1200_v54 = vsel %vm89_vm0, %v1075_v40, 0.0  ;;  %v2153_v56 = vcombine.high %v2104_v20, %v2803_v22 }
  0xf7   :  { %v1085_v58 = vmul.f32 %v2013_v63, %v2104_v20  ;;  %v1201_v15 = vadd.f32 %v1200_v54, %v1199_v14  ;;  %v1202_v59 = vsel %vm89_vm0, %v1077_v45, 0.0  ;;  %v1204_v25 = vsel %vm89_vm0, %v1079_v50, 0.0 }
  0xf8   :  { %2828 = vst [vmem:[#allocation5_spill] sm:$0xff] %v2153_v56  ;;  %v1144_v62 = vadd.f32 %v1143_v35, %v1142_v8  ;;  %v1206_v26 = vsel %vm89_vm0, %v1081_v51, 0.0  ;;  %v212_v27 = vmax.f32 %v2019_v21, 0.0  ;;  %v1208_v16 = vsel %vm89_vm0, %v1083_v7, 0.0 }
  0xf9   :  { %v1203_v30 = vadd.f32 %v1202_v59, %v1201_v15  ;;  %v214_v34 = vmax.f32 %v2055_v52, 0.0  ;;  %v213_v63 = vmax.f32 %v143_v23, 0.0  ;;  %v215_v35 = vmax.f32 %v196_v24, 0.0  ;;  %v994_v24 = vpop.permute.xlu1 %993 }
  0xfa   :  { %v1146_v38 = vadd.f32 %v1145_v55, %v1144_v62  ;;  %v290_v39 = vcombine.high %v212_v27, %v2803_v22  ;;  %v297_v40 = vrot.slane %v212_v27, %v1879_v10  ;;  %v1149_v59 = vsel %vm89_vm0, %v1086_v33, 0.0  ;;  %v998_v27 = vpop.permute.xlu0 %997 }
  0xfb   :  { %v1205_v45 = vadd.f32 %v1204_v25, %v1203_v30  ;;  %v305_v50 = vcombine.high %v214_v34, %v2803_v22  ;;  %v312_v51 = vrot.slane %v214_v34, %v1879_v10  ;;  %v554_v21 = vcombine.high %v213_v63, %v2803_v22 }
  0xfc   :  { %v1148_v8 = vadd.f32 %v1147_v46, %v1146_v38  ;;  %v304_v14 = vrot.slane %v290_v39, %v1879_v10  ;;  %v561_v7 = vrot.slane %v213_v63, %v1879_v10  ;;  %v569_v52 = vcombine.high %v215_v35, %v2803_v22 }
  0xfd   :  { %v1207_v23 = vadd.f32 %v1206_v26, %v1205_v45  ;;  %v319_v55 = vrot.slane %v305_v50, %v1879_v10  ;;  %v320_v54 = vcombine.low %v297_v40, %v312_v51  ;;  %v321_v15 = vcombine.high %v297_v40, %v312_v51 }
  0xfe   :  { %v568_v62 = vrot.slane %v554_v21, %v1879_v10  ;;  %v576_v25 = vrot.slane %v215_v35, %v1879_v10  ;;  %v583_v46 = vrot.slane %v569_v52, %v1879_v10  ;;  %v1150_v63 = vadd.f32 %v1149_v59, %v1148_v8 }
  0xff   :  { %v2181_v30 = vrot.slane %v320_v54, %v2016_v18  ;;  %v2184_v34 = vrot.slane %v321_v15, %v2016_v18  ;;  %v336_v26 = vcombine.low %v304_v14, %v319_v55  ;;  %v337_v38 = vcombine.high %v304_v14, %v319_v55  ;;  %v1002_v55 = vpop.permute.xlu1 %1001 }
 0x100   :  { %v584_v39 = vcombine.low %v561_v7, %v576_v25  ;;  %v585_v40 = vcombine.high %v561_v7, %v576_v25  ;;  %v600_v45 = vcombine.low %v568_v62, %v583_v46  ;;  %v1209_v33 = vadd.f32 %v1208_v16, %v1207_v23  ;;  %v1006_v25 = vpop.permute.xlu0 %1005 }
 0x101   :  { %v2187_v50 = vrot.slane %v336_v26, %v2016_v18  ;;  %v2191_v35 = vcombine.high %v2181_v30, %v2803_v22  ;;  %v2195_v51 = vcombine.high %v2184_v34, %v2803_v22  ;;  %v2198_v21 = vrot.slane %v337_v38, %v2016_v18 }
 0x102   :  { %v1088_v8 = vmul.f32 %v2031_v32, %v2181_v30  ;;  %v1092_v16 = vmul.f32 %v2123_v17, %v2184_v34  ;;  %v1087_v14 = vmul.f32 %v2029_v31, %v2153_v56  ;;  %v1210_v54 = vsel %vm89_vm0, %v1085_v58, 0.0 }
 0x103   :  { %2829 = vst [vmem:[#allocation6_spill] sm:$0xff] %v2187_v50  ;;  %2830 = vst [vmem:[#allocation7_spill] sm:$0xff] %v2195_v51  ;;  %v2208_v7 = vcombine.high %v2187_v50, %v2803_v22  ;;  %v1090_v52 = vmul.f32 %v2113_v29, %v2191_v35  ;;  %v1094_v23 = vmul.f32 %v2163_v28, %v2195_v51 }
 0x104   :  { %2831 = vst [vmem:[#allocation8_spill] sm:$0xff] %v2198_v21  ;;  %v2217_v15 = vcombine.high %v2198_v21, %v2803_v22  ;;  %v1151_v59 = vsel %vm89_vm0, %v1088_v8, 0.0  ;;  %v2221_v31 = vrot.slane %v584_v39, %v2016_v18  ;;  %v1211_v26 = vadd.f32 %v1210_v54, %v1209_v33 }
 0x105   :  { %2832 = vst [vmem:[#allocation9_spill] sm:$0xff] %v2208_v7  ;;  %v1096_v38 = vmul.f32 %v994_v24, %v2187_v50  ;;  %v1100_v0 = vmul.f32 %v1002_v55, %v2198_v21  ;;  %v1152_v5 = vadd.f32 %v1151_v59, %v1150_v63  ;;  %v1098_v56 = vmul.f32 %v998_v27, %v2208_v7 }
 0x106   :  { %2833 = vst [vmem:[#allocation10_spill] sm:$0xff] %v2217_v15  ;;  %v1153_v58 = vsel %vm89_vm0, %v1090_v52, 0.0  ;;  %v1155_v13 = vsel %vm89_vm0, %v1092_v16, 0.0  ;;  %v2229_v22 = vrot.slane %v585_v40, %v2016_v18  ;;  %v1157_v39 = vsel %vm89_vm0, %v1094_v23, 0.0 }
 0x107   :  { %v1154_v8 = vadd.f32 %v1153_v58, %v1152_v5  ;;  %v601_v51 = vcombine.high %v568_v62, %v583_v46  ;;  %v2233_v33 = vrot.slane %v600_v45, %v2016_v18  ;;  %v1102_v54 = vmul.f32 %v1006_v25, %v2217_v15 }
 0x108   :  { %v2835_v21 = vmov 0.0   ;;  %v1089_v40 = vmul.f32 %v2031_v32, %v2221_v31  ;;  %v1093_v46 = vmul.f32 %v2123_v17, %v2229_v22  ;;  %v1159_v45 = vsel %vm89_vm0, %v1096_v38, 0.0  ;;  %v2269_v38 = vpop.permute.xlu1 %1009 }
 0x109   :  { %2834 = vst [vmem:[#allocation11_spill] sm:$0xff] %v2233_v33  ;;  %v2238_v63 = vcombine.high %v2221_v31, %v2835_v21  ;;  %v2242_v52 = vcombine.high %v2229_v22, %v2835_v21  ;;  %v1156_v5 = vadd.f32 %v1155_v13, %v1154_v8  ;;  %v2247_v16 = vrot.slane %v601_v51, %v2016_v18  ;;  %v2261_v13 = vpop.permute.xlu0 %1013 }
 0x10a   :  { %v2251_v62 = vcombine.high %v2233_v33, %v2835_v21  ;;  %v1163_v23 = vsel %vm89_vm0, %v1100_v0, 0.0  ;;  %v1161_v58 = vsel %vm89_vm0, %v1098_v56, 0.0  ;;  %v1212_v17 = vsel %vm89_vm0, %v1087_v14, 0.0 }
 0x10b   :  { %2836 = vst [vmem:[#allocation12_spill] sm:$0xff] %v2242_v52  ;;  %2837 = vst [vmem:[#allocation13_spill] sm:$0xff] %v2247_v16  ;;  %v1091_v59 = vmul.f32 %v2113_v29, %v2238_v63  ;;  %v1095_v32 = vmul.f32 %v2163_v28, %v2242_v52  ;;  %v1158_v51 = vadd.f32 %v1157_v39, %v1156_v5  ;;  %v1214_v28 = vsel %vm89_vm0, %v1089_v40, 0.0 }
 0x10c   :  { %v2266_v8 = vcombine.high %v2247_v16, %v2835_v21  ;;  %v1097_v0 = vmul.f32 %v994_v24, %v2233_v33  ;;  %v1099_v29 = vmul.f32 %v998_v27, %v2251_v62  ;;  %v1213_v15 = vadd.f32 %v1212_v17, %v1211_v26 }
 0x10d   :  { %v1160_v50 = vadd.f32 %v1159_v45, %v1158_v51  ;;  %v1101_v39 = vmul.f32 %v1002_v55, %v2247_v16  ;;  %v1216_v56 = vsel %vm89_vm0, %v1091_v59, 0.0  ;;  %v1218_v5 = vsel %vm89_vm0, %v1093_v46, 0.0 }
 0x10e   :  { %2838 = vst [vmem:[#allocation14_spill] sm:$0xff] %v2266_v8  ;;  %v1215_v7 = vadd.f32 %v1214_v28, %v1213_v15  ;;  %v1220_v52 = vsel %vm89_vm0, %v1095_v32, 0.0  ;;  %v147_v14 = vadd.f32 %v2037_v41, %v2158_v19  ;;  %v200_v24 = vadd.f32 %v2039_v42, %v2158_v19  ;;  %v2288_v32 = vpop.permute.xlu0 %51 }
 0x10f   :  { %v1162_v27 = vadd.f32 %v1161_v58, %v1160_v50  ;;  %v1103_v26 = vmul.f32 %v1006_v25, %v2266_v8  ;;  %v149_v40 = vadd.f32 %v2047_v47, %v2158_v19  ;;  %v202_v55 = vadd.f32 %v2049_v48, %v2158_v19  ;;  %v2292_v25 = vpop.permute.xlu1 %1017 }
 0x110   :  { %v1217_v45 = vadd.f32 %v1216_v56, %v1215_v7  ;;  %v1222_v15 = vsel %vm89_vm0, %v1097_v0, 0.0  ;;  %v216_v46 = vmax.f32 %v147_v14, 0.0  ;;  %v218_v59 = vmax.f32 %v200_v24, 0.0 }
 0x111   :  { %v1224_v41 = vsel %vm89_vm0, %v1099_v29, 0.0  ;;  %v1165_v42 = vsel %vm89_vm0, %v1102_v54, 0.0  ;;  %v217_v50 = vmax.f32 %v149_v40, 0.0  ;;  %v219_v51 = vmax.f32 %v202_v55, 0.0 }
 0x112   :  { %v1219_v58 = vadd.f32 %v1218_v5, %v1217_v45  ;;  %v356_v47 = vcombine.high %v216_v46, %v2835_v21  ;;  %v363_v48 = vrot.slane %v216_v46, %v1879_v10  ;;  %v371_v19 = vcombine.high %v218_v59, %v2835_v21 }
 0x113   :  { %v1164_v7 = vadd.f32 %v1163_v23, %v1162_v27  ;;  %v378_v17 = vrot.slane %v218_v59, %v1879_v10  ;;  %v620_v0 = vcombine.high %v217_v50, %v2835_v21  ;;  %v627_v29 = vrot.slane %v217_v50, %v1879_v10  ;;  %v1026_v59 = vpop.permute.xlu0 %1025 }
 0x114   :  { %v1221_v28 = vadd.f32 %v1220_v52, %v1219_v58  ;;  %v370_v54 = vrot.slane %v356_v47, %v1879_v10  ;;  %v385_v56 = vrot.slane %v371_v19, %v1879_v10  ;;  %v635_v5 = vcombine.high %v219_v51, %v2835_v21  ;;  %v1022_v19 = vpop.permute.xlu1 %1021 }
 0x115   :  { %v386_v14 = vcombine.low %v363_v48, %v378_v17  ;;  %v387_v24 = vcombine.high %v363_v48, %v378_v17  ;;  %v634_v40 = vrot.slane %v620_v0, %v1879_v10  ;;  %v642_v55 = vrot.slane %v219_v51, %v1879_v10 }
 0x116   :  { %v1223_v23 = vadd.f32 %v1222_v15, %v1221_v28  ;;  %v402_v27 = vcombine.low %v370_v54, %v385_v56  ;;  %v403_v45 = vcombine.high %v370_v54, %v385_v56  ;;  %v649_v46 = vrot.slane %v635_v5, %v1879_v10 }
 0x117   :  { %v2307_v52 = vrot.slane %v386_v14, %v2016_v18  ;;  %v2310_v50 = vrot.slane %v387_v24, %v2016_v18  ;;  %v650_v58 = vcombine.low %v627_v29, %v642_v55  ;;  %v651_v47 = vcombine.high %v627_v29, %v642_v55 }
 0x118   :  { %v1225_v48 = vadd.f32 %v1224_v41, %v1223_v23  ;;  %v2313_v17 = vrot.slane %v402_v27, %v2016_v18  ;;  %v1166_v51 = vadd.f32 %v1165_v42, %v1164_v7  ;;  %v666_v15 = vcombine.low %v634_v40, %v649_v46 }
 0x119   :  { %v2316_v0 = vrot.slane %v403_v45, %v2016_v18  ;;  %v2320_v28 = vcombine.high %v2307_v52, %v2835_v21  ;;  %v2324_v54 = vcombine.high %v2310_v50, %v2835_v21  ;;  %v1104_v29 = vmul.f32 %v2269_v38, %v2307_v52 }
 0x11a   :  { %2839 = vst [vmem:[#allocation15_spill] sm:$0xff] %v2313_v17  ;;  %v1226_v41 = vsel %vm89_vm0, %v1101_v39, 0.0  ;;  %v1108_v7 = vmul.f32 %v2292_v25, %v2310_v50  ;;  %v2336_v14 = vcombine.high %v2313_v17, %v2835_v21  ;;  %v1228_v55 = vsel %vm89_vm0, %v1103_v26, 0.0  ;;  %v1034_v39 = vpop.permute.xlu0 %1033 }
 0x11b   :  { %2840 = vst [vmem:[#allocation16_spill] sm:$0xff] %v2316_v0  ;;  %2841 = vst [vmem:[#allocation17_spill] sm:$0xff] %v2324_v54  ;;  %v1227_v56 = vadd.f32 %v1226_v41, %v1225_v48  ;;  %v1106_v42 = vmul.f32 %v2261_v13, %v2320_v28  ;;  %v1167_v5 = vsel %vm89_vm0, %v1104_v29, 0.0  ;;  %v151_v23 = vadd.f32 %v2057_v53, %v2288_v32  ;;  %v1030_v41 = vpop.permute.xlu1 %1029 }
 0x11c   :  { %2842 = vst [vmem:[#allocation18_spill] sm:$0xff] %v2336_v14  ;;  %v1168_v24 = vadd.f32 %v1167_v5, %v1166_v51  ;;  %v2343_v27 = vcombine.high %v2316_v0, %v2835_v21  ;;  %v1110_v45 = vmul.f32 %v1022_v19, %v2324_v54  ;;  %v1112_v48 = vmul.f32 %v1026_v59, %v2313_v17 }
 0x11d   :  { %v1169_v29 = vsel %vm89_vm0, %v1106_v42, 0.0  ;;  %v1116_v8 = vmul.f32 %v1034_v39, %v2316_v0  ;;  %v2350_v26 = vrot.slane %v650_v58, %v2016_v18  ;;  %v2353_v53 = vrot.slane %v651_v47, %v2016_v18 }
 0x11e   :  { %2843 = vst [vmem:[#allocation19_spill] sm:$0xff] %v2343_v27  ;;  %v1170_v51 = vadd.f32 %v1169_v29, %v1168_v24  ;;  %v1171_v5 = vsel %vm89_vm0, %v1108_v7, 0.0  ;;  %v667_v16 = vcombine.high %v634_v40, %v649_v46  ;;  %v2357_v33 = vrot.slane %v666_v15, %v2016_v18 }
 0x11f   :  { %v1229_v54 = vadd.f32 %v1228_v55, %v1227_v56  ;;  %v2361_v42 = vcombine.high %v2350_v26, %v2835_v21  ;;  %v2365_v24 = vcombine.high %v2353_v53, %v2835_v21  ;;  %v1105_v58 = vmul.f32 %v2269_v38, %v2350_v26 }
 0x120   :  { %v1172_v17 = vadd.f32 %v1171_v5, %v1170_v51  ;;  %v1114_v47 = vmul.f32 %v1030_v41, %v2336_v14  ;;  %v1173_v40 = vsel %vm89_vm0, %v1110_v45, 0.0  ;;  %v2373_v46 = vcombine.high %v2357_v33, %v2835_v21  ;;  %v1038_v5 = vpop.permute.xlu1 %1037 }
 0x121   :  { %v220_v15 = vmax.f32 %v151_v23, 0.0  ;;  %v1107_v7 = vmul.f32 %v2261_v13, %v2361_v42  ;;  %v1109_v55 = vmul.f32 %v2292_v25, %v2353_v53  ;;  %v1230_v29 = vsel %vm89_vm0, %v1105_v58, 0.0 }
 0x122   :  { %v1174_v56 = vadd.f32 %v1173_v40, %v1172_v17  ;;  %v1175_v38 = vsel %vm89_vm0, %v1112_v48, 0.0  ;;  %v2382_v51 = vrot.slane %v667_v16, %v2016_v18  ;;  %v1231_v45 = vadd.f32 %v1230_v29, %v1229_v54 }
 0x123   :  { %v1111_v14 = vmul.f32 %v1022_v19, %v2365_v24  ;;  %v1232_v17 = vsel %vm89_vm0, %v1107_v7, 0.0  ;;  %v1118_v23 = vmul.f32 %v1038_v5, %v2343_v27  ;;  %v1177_v13 = vsel %vm89_vm0, %v1114_v47, 0.0 }
 0x124   :  { %2844 = vst [vmem:[#allocation20_spill] sm:$0xff] %v2382_v51  ;;  %v1176_v0 = vadd.f32 %v1175_v38, %v1174_v56  ;;  %v1179_v25 = vsel %vm89_vm0, %v1116_v8, 0.0  ;;  %v1233_v40 = vadd.f32 %v1232_v17, %v1231_v45  ;;  %v1113_v58 = vmul.f32 %v1026_v59, %v2357_v33 }
 0x125   :  { %v1115_v48 = vmul.f32 %v1030_v41, %v2373_v46  ;;  %v1234_v16 = vsel %vm89_vm0, %v1109_v55, 0.0  ;;  %v422_v54 = vcombine.high %v220_v15, %v2835_v21  ;;  %v2395_v19 = vcombine.high %v2382_v51, %v2835_v21 }
 0x126   :  { %v1235_v56 = vadd.f32 %v1234_v16, %v1233_v40  ;;  %v204_v7 = vadd.f32 %v2059_v60, %v2288_v32  ;;  %v153_v8 = vadd.f32 %v2075_v4, %v2288_v32  ;;  %v1178_v47 = vadd.f32 %v1177_v13, %v1176_v0 }
 0x127   :  { %2845 = vst [vmem:[#allocation21_spill] sm:$0xff] %v2395_v19  ;;  %v1117_v59 = vmul.f32 %v1034_v39, %v2382_v51  ;;  %v1236_v41 = vsel %vm89_vm0, %v1111_v14, 0.0  ;;  %v206_v55 = vadd.f32 %v2077_v6, %v2288_v32  ;;  %v429_v38 = vrot.slane %v220_v15, %v1879_v10  ;;  %v1042_v6 = vpop.permute.xlu0 %1041 }
 0x128   :  { %v1237_v29 = vadd.f32 %v1236_v41, %v1235_v56  ;;  %v222_v45 = vmax.f32 %v204_v7, 0.0  ;;  %v221_v17 = vmax.f32 %v153_v8, 0.0  ;;  %v1238_v40 = vsel %vm89_vm0, %v1113_v58, 0.0  ;;  %v1046_v41 = vpop.permute.xlu1 %1045 }
 0x129   :  { %v1240_v60 = vsel %vm89_vm0, %v1115_v48, 0.0  ;;  %v436_v16 = vrot.slane %v422_v54, %v1879_v10  ;;  %v223_v4 = vmax.f32 %v206_v55, 0.0  ;;  %v1180_v32 = vadd.f32 %v1179_v25, %v1178_v47 }
 0x12a   :  { %v1239_v0 = vadd.f32 %v1238_v40, %v1237_v29  ;;  %v437_v39 = vcombine.high %v222_v45, %v2835_v21  ;;  %v444_v14 = vrot.slane %v222_v45, %v1879_v10  ;;  %v686_v13 = vcombine.high %v221_v17, %v2835_v21 }
 0x12b   :  { %v693_v15 = vrot.slane %v221_v17, %v1879_v10  ;;  %v701_v56 = vcombine.high %v223_v4, %v2835_v21  ;;  %v708_v58 = vrot.slane %v223_v4, %v1879_v10  ;;  %v1119_v25 = vmul.f32 %v1038_v5, %v2395_v19 }
 0x12c   :  { %v1241_v7 = vadd.f32 %v1240_v60, %v1239_v0  ;;  %v451_v48 = vrot.slane %v437_v39, %v1879_v10  ;;  %v452_v54 = vcombine.low %v429_v38, %v444_v14  ;;  %v453_v8 = vcombine.high %v429_v38, %v444_v14 }
 0x12d   :  { %v700_v55 = vrot.slane %v686_v13, %v1879_v10  ;;  %v715_v29 = vrot.slane %v701_v56, %v1879_v10  ;;  %v716_v45 = vcombine.low %v693_v15, %v708_v58  ;;  %v717_v40 = vcombine.high %v693_v15, %v708_v58  ;;  %v1050_v13 = vpop.permute.xlu0 %1049 }
 0x12e   :  { %v2420_v47 = vrot.slane %v452_v54, %v2016_v18  ;;  %v468_v17 = vcombine.low %v436_v16, %v451_v48  ;;  %v2423_v4 = vrot.slane %v453_v8, %v2016_v18  ;;  %v469_v60 = vcombine.high %v436_v16, %v451_v48 }
 0x12f   :  { %v2426_v0 = vrot.slane %v716_v45, %v2016_v18  ;;  %v732_v38 = vcombine.low %v700_v55, %v715_v29  ;;  %v1242_v39 = vsel %vm89_vm0, %v1117_v59, 0.0  ;;  %v1181_v14 = vsel %vm89_vm0, %v1118_v23, 0.0  ;;  %v1054_v59 = vpop.permute.xlu1 %1053 }
 0x130   :  { %v2431_v10 = vcombine.high %v2420_v47, %v2835_v21  ;;  %v1120_v5 = vmul.f32 %v1042_v6, %v2420_v47  ;;  %v1243_v15 = vadd.f32 %v1242_v39, %v1241_v7  ;;  %v1182_v56 = vadd.f32 %v1181_v14, %v1180_v32 }
 0x131   :  { %v2436_v58 = vrot.slane %v717_v40, %v2016_v18  ;;  %v733_v16 = vcombine.high %v700_v55, %v715_v29  ;;  %v2440_v48 = vcombine.high %v2426_v0, %v2835_v21  ;;  %v2443_v54 = vrot.slane %v468_v17, %v2016_v18  ;;  %v1058_v19 = vpop.permute.xlu0 %1057 }
 0x132   :  { %v2447_v8 = vcombine.high %v2423_v4, %v2835_v21  ;;  %v1244_v23 = vsel %vm89_vm0, %v1119_v25, 0.0  ;;  %v1122_v32 = vmul.f32 %v1046_v41, %v2431_v10  ;;  %v1183_v7 = vsel %vm89_vm0, %v1120_v5, 0.0 }
 0x133   :  { %v2453_v55 = vrot.slane %v732_v38, %v2016_v18  ;;  %v1121_v29 = vmul.f32 %v1042_v6, %v2426_v0  ;;  %v1184_v45 = vadd.f32 %v1183_v7, %v1182_v56  ;;  %v2458_v40 = vcombine.high %v2436_v58, %v2835_v21 }
 0x134   :  { %2846 = vst [vmem:[#allocation22_spill] sm:$0xff] %v2447_v8  ;;  %v1123_v17 = vmul.f32 %v1046_v41, %v2440_v48  ;;  %v1245_v39 = vadd.f32 %v1244_v23, %v1243_v15  ;;  %v1124_v14 = vmul.f32 %v1050_v13, %v2423_v4  ;;  %v2464_v5 = vrot.slane %v469_v60, %v2016_v18  ;;  %v1062_v15 = vpop.permute.xlu1 %1061 }
 0x135   :  { %2847 = vst [vmem:[#allocation23_spill] sm:$0xff] %v2453_v55  ;;  %2848 = vst [vmem:[#allocation24_spill] sm:$0xff] %v2458_v40  ;;  %v1246_v25 = vsel %vm89_vm0, %v1121_v29, 0.0  ;;  %v1125_v38 = vmul.f32 %v1050_v13, %v2436_v58  ;;  %v1126_v6 = vmul.f32 %v1054_v59, %v2447_v8  ;;  %v1185_v56 = vsel %vm89_vm0, %v1122_v32, 0.0 }
 0x136   :  { %v1247_v27 = vadd.f32 %v1246_v25, %v1245_v39  ;;  %v2470_v7 = vrot.slane %v733_v16, %v2016_v18  ;;  %v2474_v41 = vcombine.high %v2443_v54, %v2835_v21  ;;  %v1127_v23 = vmul.f32 %v1054_v59, %v2458_v40 }
 0x137   :  { %v1248_v60 = vsel %vm89_vm0, %v1123_v17, 0.0  ;;  %v2480_v13 = vcombine.high %v2453_v55, %v2835_v21  ;;  %v1186_v29 = vadd.f32 %v1185_v56, %v1184_v45  ;;  %v1187_v39 = vsel %vm89_vm0, %v1124_v14, 0.0  ;;  %v1066_v45 = vpop.permute.xlu0 %1065 }
 0x138   :  { %2849 = vst [vmem:[#allocation25_spill] sm:$0xff] %v2474_v41  ;;  %v1128_v32 = vmul.f32 %v1058_v19, %v2443_v54  ;;  %v1249_v18 = vadd.f32 %v1248_v60, %v1247_v27  ;;  %v1250_v16 = vsel %vm89_vm0, %v1125_v38, 0.0  ;;  %v1129_v25 = vmul.f32 %v1058_v19, %v2453_v55 }
 0x139   :  { %2850 = vst [vmem:[#allocation26_spill] sm:$0xff] %v2480_v13  ;;  %v1188_v8 = vadd.f32 %v1187_v39, %v1186_v29  ;;  %v2488_v59 = vcombine.high %v2464_v5, %v2835_v21  ;;  %v1130_v17 = vmul.f32 %v1062_v15, %v2474_v41  ;;  %v1189_v40 = vsel %vm89_vm0, %v1126_v6, 0.0  ;;  %v1070_v39 = vpop.permute.xlu1 %1069 }
 0x13a   :  { %v1251_v51 = vadd.f32 %v1250_v16, %v1249_v18  ;;  %v2494_v14 = vcombine.high %v2470_v7, %v2835_v21  ;;  %v1131_v27 = vmul.f32 %v1062_v15, %v2480_v13  ;;  %v1252_v19 = vsel %vm89_vm0, %v1127_v23, 0.0 }
 0x13b   :  { %v1190_v38 = vadd.f32 %v1189_v40, %v1188_v8  ;;  %v1132_v56 = vmul.f32 %v1066_v45, %v2464_v5  ;;  %v1191_v60 = vsel %vm89_vm0, %v1128_v32, 0.0  ;;  %v1133_v41 = vmul.f32 %v1066_v45, %v2470_v7 }
 0x13c   :  { %v1253_v29 = vadd.f32 %v1252_v19, %v1251_v51  ;;  %v1254_v18 = vsel %vm89_vm0, %v1129_v25, 0.0  ;;  %v1134_v16 = vmul.f32 %v1070_v39, %v2488_v59  ;;  %v1193_v21 = vsel %vm89_vm0, %v1130_v17, 0.0 }
 0x13d   :  { %v1192_v6 = vadd.f32 %v1191_v60, %v1190_v38  ;;  %v1135_v8 = vmul.f32 %v1070_v39, %v2494_v14  ;;  %v1256_v15 = vsel %vm89_vm0, %v1131_v27, 0.0  ;;  %v1195_v23 = vsel %vm89_vm0, %v1132_v56, 0.0 }
 0x13e   :  { %v1255_v55 = vadd.f32 %v1254_v18, %v1253_v29  ;;  %v1258_v19 = vsel %vm89_vm0, %v1133_v41, 0.0  ;;  %v1197_v45 = vsel %vm89_vm0, %v1134_v16, 0.0 }
 0x13f   :  { %v1194_v40 = vadd.f32 %v1193_v21, %v1192_v6  ;;  %v1260_v60 = vsel %vm89_vm0, %v1135_v8, 0.0 }
 0x140   :  { %v1257_v32 = vadd.f32 %v1256_v15, %v1255_v55 }
 0x141   :  { %v1196_v51 = vadd.f32 %v1195_v23, %v1194_v40 }
 0x142   :  { %v1259_v38 = vadd.f32 %v1258_v19, %v1257_v32 }
 0x143   :  { %v1198_v25 = vadd.f32 %v1197_v45, %v1196_v51 }
 0x144   :  { %v1261_v13 = vadd.f32 %v1260_v60, %v1259_v38 }
 0x145   :  { %v1262_v17 = vsel %vm89_vm0, %v1198_v25, -inf }
 0x146   :  { %v1263_v29 = vsel %vm89_vm0, %v1261_v13, -inf }
 0x147   :  { %v1264_v39 = vmax.f32 %v1262_v17, %v1263_v29 }
 0x149   :  { %1265 = vmax.xlane.f32.xlu0 %v1264_v39 }
 0x1d6   :  { %v1266_v27 = vpop.xlane.xlu0 %1265 }
 0x1d7   :  { %v1267_v6 = vsub.f32 %v1198_v25, %v1266_v27  ;;  %v1268_v56 = vsub.f32 %v1261_v13, %v1266_v27 }
 0x1d9   :  { %v1269_v55 = vmul.f32 1.442695, %v1267_v6  ;;  %v1271_v18 = vmul.f32 1.442695, %v1268_v56 }
 0x1db   :  { %1821 = vpow2.f32 %v1269_v55 }
 0x1dc   :  { %1823 = vpow2.f32 %v1271_v18 }
 0x1e5   :  { %v1822_v41 = vpop.eup %1821 }
 0x1e6   :  { %v1824_v16 = vpop.eup %1823  ;;  %v1273_v21 = vsel %vm89_vm0, %v1822_v41, 0.0 }
 0x1e7   :  { %v1274_v8 = vsel %vm89_vm0, %v1824_v16, 0.0 }
 0x1e8   :  { %v1275_v40 = vadd.f32 %v1274_v8, %v1273_v21 }
 0x1ea   :  { %1276 = vadd.xlane.f32.xlu1 %v1275_v40 }
 0x277   :  { %v1277_v15 = vpop.xlane.xlu1 %1276 }
 0x278   :  { %1825 = vrcp.f32 %v1277_v15 }
 0x282   :  { %v1826_v23 = vpop.eup %1825 }
 0x283   :  { %v2514_v32 = vmul.f32 %v1826_v23, %v1822_v41  ;;  %v2516_v51 = vmul.f32 %v1826_v23, %v1824_v16 }
 0x285   :  { %v1292_v13 = vmul.f32 %v2514_v32, %v2045_v44  ;;  %v1293_v19 = vmul.f32 %v2516_v51, %v2084_v9  ;;  %v1288_v45 = vmul.f32 %v2514_v32, %v2042_v43  ;;  %v1289_v38 = vmul.f32 %v2516_v51, %v2052_v49 }
 0x286   :  { %v1304_v25 = vmul.f32 %v2514_v32, %v2181_v30  ;;  %v1305_v60 = vmul.f32 %v2516_v51, %v2221_v31  ;;  %v1290_v17 = vmul.f32 %v2514_v32, %v2069_v2  ;;  %v1291_v44 = vmul.f32 %v2516_v51, %v2121_v57 }
 0x287   :  { %v1362_v9 = vsel %vm89_vm0, %v1292_v13, 0.0  ;;  %v1363_v29 = vsel %vm89_vm0, %v1293_v19, 0.0  ;;  %v1352_v43 = vsel %vm89_vm0, %v1288_v45, 0.0  ;;  %v1353_v49 = vsel %vm89_vm0, %v1289_v38, 0.0 }
 0x288   :  { %v1364_v39 = vadd.f32 %v1363_v29, %v1362_v9  ;;  %v1354_v27 = vadd.f32 %v1353_v49, %v1352_v43  ;;  %v1392_v30 = vsel %vm89_vm0, %v1304_v25, 0.0  ;;  %v1393_v31 = vsel %vm89_vm0, %v1305_v60, 0.0  ;;  %v2851_v29 = vld [vmem:[#allocation7_spill] sm:$0xff]  ;;  %v2852_v43 = vld [vmem:[#allocation12_spill] sm:$0xff] }
 0x289   :  { %v1394_v6 = vadd.f32 %v1393_v31, %v1392_v30  ;;  %v1357_v2 = vsel %vm89_vm0, %v1290_v17, 0.0  ;;  %v1358_v56 = vsel %vm89_vm0, %v1291_v44, 0.0  ;;  %v1296_v57 = vmul.f32 %v2514_v32, %v2062_v61 }
 0x28a   :  { %1365 = vadd.xlane.f32.xlu1 %v1364_v39  ;;  %1355 = vadd.xlane.f32.xlu0 %v1354_v27  ;;  %v1359_v55 = vadd.f32 %v1358_v56, %v1357_v2  ;;  %v1297_v18 = vmul.f32 %v2516_v51, %v2087_v11  ;;  %v1294_v41 = vmul.f32 %v2514_v32, %v2073_v3 }
 0x28b   :  { %v1372_v16 = vsel %vm89_vm0, %v1296_v57, 0.0  ;;  %v1295_v21 = vmul.f32 %v2516_v51, %v2129_v36  ;;  %v1298_v8 = vmul.f32 %v2514_v32, %v2091_v12  ;;  %v1299_v61 = vmul.f32 %v2516_v51, %v2133_v37 }
 0x28c   :  { %v1373_v40 = vsel %vm89_vm0, %v1297_v18, 0.0  ;;  %v1367_v15 = vsel %vm89_vm0, %v1294_v41, 0.0  ;;  %v1306_v11 = vmul.f32 %v2514_v32, %v2191_v35  ;;  %v1307_v3 = vmul.f32 %v2516_v51, %v2238_v63  ;;  %v2853_v18 = vld [vmem:[#allocation9_spill] sm:$0xff] }
 0x28d   :  { %v1368_v23 = vsel %vm89_vm0, %v1295_v21, 0.0  ;;  %v1374_v36 = vadd.f32 %v1373_v40, %v1372_v16  ;;  %v1377_v12 = vsel %vm89_vm0, %v1298_v8, 0.0  ;;  %v1378_v37 = vsel %vm89_vm0, %v1299_v61, 0.0  ;;  %v2854_v21 = vld [vmem:[#allocation6_spill] sm:$0xff]  ;;  %v2855_v8 = vld [vmem:[#allocation11_spill] sm:$0xff] }
 0x28e   :  { %1395 = vadd.xlane.f32.xlu1 %v1394_v6  ;;  %1360 = vadd.xlane.f32.xlu0 %v1359_v55  ;;  %v1369_v13 = vadd.f32 %v1368_v23, %v1367_v15  ;;  %v1397_v19 = vsel %vm89_vm0, %v1306_v11, 0.0  ;;  %v1398_v45 = vsel %vm89_vm0, %v1307_v3, 0.0  ;;  %v1320_v35 = vmul.f32 %v2514_v32, %v2307_v52 }
 0x28f   :  { %v1321_v63 = vmul.f32 %v2516_v51, %v2350_v26  ;;  %v1308_v38 = vmul.f32 %v2514_v32, %v2184_v34  ;;  %v1309_v25 = vmul.f32 %v2516_v51, %v2229_v22  ;;  %v1379_v60 = vadd.f32 %v1378_v37, %v1377_v12 }
 0x290   :  { %v1399_v17 = vadd.f32 %v1398_v45, %v1397_v19  ;;  %v1300_v44 = vmul.f32 %v2514_v32, %v2065_v1  ;;  %v1301_v9 = vmul.f32 %v2516_v51, %v2104_v20  ;;  %v1432_v52 = vsel %vm89_vm0, %v1320_v35, 0.0  ;;  %v2856_v45 = vld [vmem:[#allocation4_spill] sm:$0xff] }
 0x291   :  { %v1433_v26 = vsel %vm89_vm0, %v1321_v63, 0.0  ;;  %v1310_v34 = vmul.f32 %v2514_v32, %v2851_v29  ;;  %v1311_v22 = vmul.f32 %v2516_v51, %v2852_v43  ;;  %v1402_v49 = vsel %vm89_vm0, %v1308_v38, 0.0  ;;  %v2857_v63 = vld [vmem:[#allocation5_spill] sm:$0xff] }
 0x292   :  { %1375 = vadd.xlane.f32.xlu1 %v1374_v36  ;;  %1370 = vadd.xlane.f32.xlu0 %v1369_v13  ;;  %v1403_v39 = vsel %vm89_vm0, %v1309_v25, 0.0  ;;  %v1434_v1 = vadd.f32 %v1433_v26, %v1432_v52  ;;  %v1382_v27 = vsel %vm89_vm0, %v1300_v44, 0.0  ;;  %v1383_v30 = vsel %vm89_vm0, %v1301_v9, 0.0 }
 0x293   :  { %v1404_v20 = vadd.f32 %v1403_v39, %v1402_v49  ;;  %v1407_v31 = vsel %vm89_vm0, %v1310_v34, 0.0  ;;  %v1408_v6 = vsel %vm89_vm0, %v1311_v22, 0.0  ;;  %v1324_v2 = vmul.f32 %v2514_v32, %v2310_v50  ;;  %v2860_v34 = vld [vmem:[#allocation17_spill] sm:$0xff] }
 0x294   :  { %v1325_v56 = vmul.f32 %v2516_v51, %v2353_v53  ;;  %v1322_v57 = vmul.f32 %v2514_v32, %v2320_v28  ;;  %v1323_v55 = vmul.f32 %v2516_v51, %v2361_v42  ;;  %v1314_v41 = vmul.f32 %v2514_v32, %v2853_v18 }
 0x295   :  { %v1315_v16 = vmul.f32 %v2516_v51, %v2251_v62  ;;  %v1312_v50 = vmul.f32 %v2514_v32, %v2854_v21  ;;  %v1313_v53 = vmul.f32 %v2516_v51, %v2855_v8  ;;  %v1384_v61 = vadd.f32 %v1383_v30, %v1382_v27  ;;  %v2862_v8 = vld [vmem:[#allocation15_spill] sm:$0xff] }
 0x296   :  { %1380 = vadd.xlane.f32.xlu1 %v1379_v60  ;;  %1400 = vadd.xlane.f32.xlu0 %v1399_v17  ;;  %v1409_v40 = vadd.f32 %v1408_v6, %v1407_v31  ;;  %v1442_v28 = vsel %vm89_vm0, %v1324_v2, 0.0  ;;  %v1443_v42 = vsel %vm89_vm0, %v1325_v56, 0.0  ;;  %v1437_v15 = vsel %vm89_vm0, %v1322_v57, 0.0  ;;  %v2861_v56 = vld [vmem:[#allocation18_spill] sm:$0xff] }
 0x297   :  { %v1438_v11 = vsel %vm89_vm0, %v1323_v55, 0.0  ;;  %v1417_v62 = vsel %vm89_vm0, %v1314_v41, 0.0  ;;  %v1418_v3 = vsel %vm89_vm0, %v1315_v16, 0.0  ;;  %v1412_v23 = vsel %vm89_vm0, %v1312_v50, 0.0 }
 0x298   :  { %v1413_v36 = vsel %vm89_vm0, %v1313_v53, 0.0  ;;  %v1336_v13 = vmul.f32 %v2514_v32, %v2420_v47  ;;  %v1337_v12 = vmul.f32 %v2516_v51, %v2426_v0  ;;  %v1444_v37 = vadd.f32 %v1443_v42, %v1442_v28  ;;  %v2858_v47 = vld [vmem:[#allocation8_spill] sm:$0xff]  ;;  %v2859_v0 = vld [vmem:[#allocation13_spill] sm:$0xff] }
 0x299   :  { %v1439_v19 = vadd.f32 %v1438_v11, %v1437_v15  ;;  %v1302_v35 = vmul.f32 %v2514_v32, %v2856_v45  ;;  %v1303_v38 = vmul.f32 %v2516_v51, %v2857_v63  ;;  %v1419_v25 = vadd.f32 %v1418_v3, %v1417_v62  ;;  %v2863_v62 = vld [vmem:[#allocation16_spill] sm:$0xff] }
 0x29a   :  { %1435 = vadd.xlane.f32.xlu1 %v1434_v1  ;;  %1405 = vadd.xlane.f32.xlu0 %v1404_v20  ;;  %v1414_v60 = vadd.f32 %v1413_v36, %v1412_v23  ;;  %v1472_v17 = vsel %vm89_vm0, %v1336_v13, 0.0  ;;  %v1473_v44 = vsel %vm89_vm0, %v1337_v12, 0.0  ;;  %v1316_v9 = vmul.f32 %v2514_v32, %v2858_v47  ;;  %v2864_v23 = vld [vmem:[#allocation20_spill] sm:$0xff]  ;;  %v2865_v13 = vld [vmem:[#allocation10_spill] sm:$0xff] }
 0x29b   :  { %v1317_v52 = vmul.f32 %v2516_v51, %v2859_v0  ;;  %v1387_v26 = vsel %vm89_vm0, %v1302_v35, 0.0  ;;  %v1388_v29 = vsel %vm89_vm0, %v1303_v38, 0.0  ;;  %v1326_v43 = vmul.f32 %v2514_v32, %v2860_v34  ;;  %v2866_v35 = vld [vmem:[#allocation14_spill] sm:$0xff]  ;;  %v2868_v0 = vld [vmem:[#allocation21_spill] sm:$0xff] }
 0x29c   :  { %v1327_v22 = vmul.f32 %v2516_v51, %v2365_v24  ;;  %v1340_v49 = vmul.f32 %v2514_v32, %v2423_v4  ;;  %v1341_v39 = vmul.f32 %v2516_v51, %v2436_v58  ;;  %v1474_v1 = vadd.f32 %v1473_v44, %v1472_v17  ;;  %v2869_v34 = vld [vmem:[#allocation22_spill] sm:$0xff] }
 0x29d   :  { %v1389_v27 = vadd.f32 %v1388_v29, %v1387_v26  ;;  %v1422_v20 = vsel %vm89_vm0, %v1316_v9, 0.0  ;;  %v1423_v30 = vsel %vm89_vm0, %v1317_v52, 0.0  ;;  %v1447_v31 = vsel %vm89_vm0, %v1326_v43, 0.0 }
 0x29e   :  { %1385 = vadd.xlane.f32.xlu1 %v1384_v61  ;;  %1410 = vadd.xlane.f32.xlu0 %v1409_v40  ;;  %v1448_v6 = vsel %vm89_vm0, %v1327_v22, 0.0  ;;  %v1338_v24 = vmul.f32 %v2514_v32, %v2431_v10  ;;  %v1339_v2 = vmul.f32 %v2516_v51, %v2440_v48  ;;  %v1482_v4 = vsel %vm89_vm0, %v1340_v49, 0.0  ;;  %v2870_v22 = vld [vmem:[#allocation24_spill] sm:$0xff] }
 0x29f   :  { %v1483_v58 = vsel %vm89_vm0, %v1341_v39, 0.0  ;;  %v1330_v57 = vmul.f32 %v2514_v32, %v2861_v56  ;;  %v1424_v55 = vadd.f32 %v1423_v30, %v1422_v20  ;;  %v1449_v18 = vadd.f32 %v1448_v6, %v1447_v31 }
 0x2a0   :  { %v1331_v41 = vmul.f32 %v2516_v51, %v2373_v46  ;;  %v1477_v16 = vsel %vm89_vm0, %v1338_v24, 0.0  ;;  %v1478_v10 = vsel %vm89_vm0, %v1339_v2, 0.0  ;;  %v1350_v48 = vmul.f32 %v2514_v32, %v2488_v59 }
 0x2a1   :  { %v1351_v21 = vmul.f32 %v2516_v51, %v2494_v14  ;;  %v1484_v50 = vadd.f32 %v1483_v58, %v1482_v4  ;;  %v1328_v53 = vmul.f32 %v2514_v32, %v2862_v8  ;;  %v1329_v61 = vmul.f32 %v2516_v51, %v2357_v33  ;;  %v2871_v4 = vld [vmem:[#allocation23_spill] sm:$0xff] }
 0x2a2   :  { %1445 = vadd.xlane.f32.xlu1 %v1444_v37  ;;  %1440 = vadd.xlane.f32.xlu0 %v1439_v19  ;;  %v1281_v46 = vmul.f32 %v2514_v32, %v2514_v32  ;;  %v1457_v40 = vsel %vm89_vm0, %v1330_v57, 0.0  ;;  %v1507_v28 = vsel %vm89_vm0, %v1350_v48, 0.0  ;;  %v1282_v14 = vmul.f32 %v2516_v51, %v2516_v51 }
 0x2a3   :  { %v1508_v59 = vsel %vm89_vm0, %v1351_v21, 0.0  ;;  %v1479_v42 = vadd.f32 %v1478_v10, %v1477_v16  ;;  %v1458_v15 = vsel %vm89_vm0, %v1331_v41, 0.0  ;;  %v1332_v3 = vmul.f32 %v2514_v32, %v2863_v62  ;;  %v2873_v10 = vld [vmem:[#allocation26_spill] sm:$0xff] }
 0x2a4   :  { %v1509_v11 = vadd.f32 %v1508_v59, %v1507_v28  ;;  %v1283_v33 = vsel %vm89_vm0, %v1281_v46, 0.0  ;;  %v1333_v36 = vmul.f32 %v2516_v51, %v2864_v23  ;;  %v1318_v12 = vmul.f32 %v2514_v32, %v2865_v13 }
 0x2a5   :  { %v1284_v37 = vsel %vm89_vm0, %v1282_v14, 0.0  ;;  %v1452_v19 = vsel %vm89_vm0, %v1328_v53, 0.0  ;;  %v1453_v45 = vsel %vm89_vm0, %v1329_v61, 0.0  ;;  %v1319_v63 = vmul.f32 %v2516_v51, %v2866_v35 }
 0x2a6   :  { %1420 = vadd.xlane.f32.xlu1 %v1419_v25  ;;  %1415 = vadd.xlane.f32.xlu0 %v1414_v60  ;;  %v2682_v38 = vadd.f32 %v1284_v37, %v1283_v33  ;;  %v1459_v25 = vadd.f32 %v1458_v15, %v1457_v40  ;;  %v2867_v60 = vld [vmem:[#allocation19_spill] sm:$0xff]  ;;  %v1454_v44 = vadd.f32 %v1453_v45, %v1452_v19  ;;  %v1462_v47 = vsel %vm89_vm0, %v1332_v3, 0.0 }
 0x2a7   :  { %v1334_v17 = vmul.f32 %v2514_v32, %v2867_v60  ;;  %v1463_v9 = vsel %vm89_vm0, %v1333_v36, 0.0  ;;  %v1335_v52 = vmul.f32 %v2516_v51, %v2868_v0  ;;  %v1427_v26 = vsel %vm89_vm0, %v1318_v12, 0.0  ;;  %v2875_v3 = vld [vmem:[#allocation3_spill] sm:$0xff] }
 0x2a8   :  { %v1428_v29 = vsel %vm89_vm0, %v1319_v63, 0.0  ;;  %v1342_v43 = vmul.f32 %v2514_v32, %v2869_v34  ;;  %v1343_v49 = vmul.f32 %v2516_v51, %v2870_v22  ;;  %v1464_v39 = vadd.f32 %v1463_v9, %v1462_v47 }
 0x2a9   :  { %v1468_v20 = vsel %vm89_vm0, %v1335_v52, 0.0  ;;  %v1348_v30 = vmul.f32 %v2514_v32, %v2464_v5  ;;  %v1349_v31 = vmul.f32 %v2516_v51, %v2470_v7  ;;  %v1344_v2 = vmul.f32 %v2514_v32, %v2443_v54  ;;  %v2872_v5 = vld [vmem:[#allocation25_spill] sm:$0xff] }
 0x2aa   :  { %1475 = vadd.xlane.f32.xlu1 %v1474_v1  ;;  %1390 = vadd.xlane.f32.xlu0 %v1389_v27  ;;  %v1467_v1 = vsel %vm89_vm0, %v1334_v17, 0.0  ;;  %v1429_v27 = vadd.f32 %v1428_v29, %v1427_v26  ;;  %v1487_v6 = vsel %vm89_vm0, %v1342_v43, 0.0  ;;  %v1488_v24 = vsel %vm89_vm0, %v1343_v49, 0.0 }
 0x2ab   :  { %v1345_v58 = vmul.f32 %v2516_v51, %v2871_v4  ;;  %v1469_v56 = vadd.f32 %v1468_v20, %v1467_v1  ;;  %v1489_v57 = vadd.f32 %v1488_v24, %v1487_v6  ;;  %v1503_v7 = vsel %vm89_vm0, %v1349_v31, 0.0 }
 0x2ac   :  { %v1492_v41 = vsel %vm89_vm0, %v1344_v2, 0.0  ;;  %v1347_v54 = vmul.f32 %v2516_v51, %v2873_v10 }
 0x2ad   :  { %v1493_v16 = vsel %vm89_vm0, %v1345_v58, 0.0 }
 0x2ae   :  { %1425 = vadd.xlane.f32.xlu1 %v1424_v55  ;;  %1450 = vadd.xlane.f32.xlu0 %v1449_v18  ;;  %v1502_v55 = vsel %vm89_vm0, %v1348_v30, 0.0  ;;  %v1346_v18 = vmul.f32 %v2514_v32, %v2872_v5  ;;  %v1494_v21 = vadd.f32 %v1493_v16, %v1492_v41  ;;  %v1498_v8 = vsel %vm89_vm0, %v1347_v54, 0.0 }
 0x2af   :  { %v1504_v48 = vadd.f32 %v1503_v7, %v1502_v55 }
 0x2b2   :  { %1485 = vadd.xlane.f32.xlu1 %v1484_v50  ;;  %1480 = vadd.xlane.f32.xlu0 %v1479_v42  ;;  %v1497_v50 = vsel %vm89_vm0, %v1346_v18, 0.0  ;;  %v2874_v42 = vlaneseq }
 0x2b3   :  { %v1499_v32 = vadd.f32 %v1498_v8, %v1497_v50 }
 0x2b4   :  { %v1545_v15 = vand.u32 127, %v2874_v42 }
 0x2b6   :  { %1460 = vadd.xlane.f32.xlu1 %v1459_v25  ;;  %1455 = vadd.xlane.f32.xlu0 %v1454_v44  ;;  %v2720_v23 = vsub.s32 %v1545_v15, %v2875_v3 }
 0x2ba   :  { %1465 = vadd.xlane.f32.xlu1 %v1464_v39  ;;  %1430 = vadd.xlane.f32.xlu0 %v1429_v27 }
 0x2be   :  { %1470 = vadd.xlane.f32.xlu1 %v1469_v56  ;;  %1490 = vadd.xlane.f32.xlu0 %v1489_v57 }
 0x2c2   :  { %1505 = vadd.xlane.f32.xlu1 %v1504_v48  ;;  %1495 = vadd.xlane.f32.xlu0 %v1494_v21 }
 0x2c6   :  { %1500 = vadd.xlane.f32.xlu0 %v1499_v32 }
 0x2ca   :  { %1510 = vadd.xlane.f32.xlu0 %v1509_v11 }
 0x317   :  { %v1366_v53 = vpop.xlane.xlu1 %1365  ;;  %v1356_v61 = vpop.xlane.xlu0 %1355 }
 0x318   :  { %v1549_v11 = vrot.slane %v1356_v61, %v2720_v23  ;;  %v1557_v63 = vrot.slane %v1366_v53, %v2720_v23 }
 0x31b   :  { %v1396_v46 = vpop.xlane.xlu1 %1395  ;;  %v1361_v40 = vpop.xlane.xlu0 %1360 }
 0x31c   :  { %v1553_v12 = vrot.slane %v1361_v40, %v2720_v23  ;;  %v1581_v6 = vrot.slane %v1396_v46, %v2720_v23 }
 0x31e   :  { %v1675_v45 = vsel %vm1674_vm2, %v1553_v12, %v1549_v11 }
 0x31f   :  { %v1376_v28 = vpop.xlane.xlu1 %1375  ;;  %v1371_v59 = vpop.xlane.xlu0 %1370  ;;  %v1677_v60 = vsel %vm1676_vm3, %v1557_v63, %v1675_v45 }
 0x320   :  { %v1561_v35 = vrot.slane %v1371_v59, %v2720_v23  ;;  %v1565_v25 = vrot.slane %v1376_v28, %v2720_v23 }
 0x322   :  { %v1679_v47 = vsel %vm1678_vm4, %v1561_v35, %v1677_v60 }
 0x323   :  { %v1381_v51 = vpop.xlane.xlu1 %1380  ;;  %v1401_v14 = vpop.xlane.xlu0 %1400  ;;  %v1681_v52 = vsel %vm1680_vm5, %v1565_v25, %v1679_v47 }
 0x324   :  { %v1569_v9 = vrot.slane %v1381_v51, %v2720_v23  ;;  %v1585_v27 = vrot.slane %v1401_v14, %v2720_v23 }
 0x326   :  { %v1683_v34 = vsel %vm1682_vm6, %v1569_v9, %v1681_v52  ;;  %v1688_v58 = vsel %vm1674_vm2, %v1585_v27, %v1581_v6 }
 0x327   :  { %v1436_v33 = vpop.xlane.xlu1 %1435  ;;  %v1406_v62 = vpop.xlane.xlu0 %1405 }
 0x328   :  { %v1589_v20 = vrot.slane %v1406_v62, %v2720_v23  ;;  %v1613_v56 = vrot.slane %v1436_v33, %v2720_v23 }
 0x32a   :  { %v1689_v57 = vsel %vm1676_vm3, %v1589_v20, %v1688_v58 }
 0x32b   :  { %v1386_v36 = vpop.xlane.xlu1 %1385  ;;  %v1411_v13 = vpop.xlane.xlu0 %1410 }
 0x32c   :  { %v1573_v0 = vrot.slane %v1386_v36, %v2720_v23  ;;  %v1593_v24 = vrot.slane %v1411_v13, %v2720_v23 }
 0x32e   :  { %v1685_v22 = vsel %vm1684_vm7, %v1573_v0, %v1683_v34  ;;  %v1690_v7 = vsel %vm1678_vm4, %v1593_v24, %v1689_v57 }
 0x32f   :  { %v1446_v37 = vpop.xlane.xlu1 %1445  ;;  %v1441_v19 = vpop.xlane.xlu0 %1440 }
 0x330   :  { %v1617_v2 = vrot.slane %v1441_v19, %v2720_v23  ;;  %v1621_v55 = vrot.slane %v1446_v37, %v2720_v23 }
 0x332   :  { %v1695_v41 = vsel %vm1674_vm2, %v1617_v2, %v1613_v56 }
 0x333   :  { %v1421_v17 = vpop.xlane.xlu1 %1420  ;;  %v1416_v44 = vpop.xlane.xlu0 %1415  ;;  %v1696_v50 = vsel %vm1676_vm3, %v1621_v55, %v1695_v41 }
 0x334   :  { %v1597_v4 = vrot.slane %v1416_v44, %v2720_v23  ;;  %v1601_v16 = vrot.slane %v1421_v17, %v2720_v23 }
 0x336   :  { %v1691_v54 = vsel %vm1680_vm5, %v1597_v4, %v1690_v7 }
 0x337   :  { %v1476_v26 = vpop.xlane.xlu1 %1475  ;;  %v1391_v29 = vpop.xlane.xlu0 %1390  ;;  %v1692_v53 = vsel %vm1682_vm6, %v1601_v16, %v1691_v54 }
 0x338   :  { %v1577_v43 = vrot.slane %v1391_v29, %v2720_v23  ;;  %v1645_v13 = vrot.slane %v1476_v26, %v2720_v23 }
 0x33a   :  { %v1687_v49 = vsel %vm1686_vm8, %v1577_v43, %v1685_v22  ;;  %v1811_v43 = vld [vmem:[%s2796_s4] ss:$0 sm:$0xff] }
 0x33b   :  { %v1426_v39 = vpop.xlane.xlu1 %1425  ;;  %1713 = vxpose.xlu1.b32.start [1/4] (short) (narrow) %v1687_v49, 8  ;;  %v1451_v1 = vpop.xlane.xlu0 %1450 }
 0x33c   :  { %v1625_v10 = vrot.slane %v1451_v1, %v2720_v23  ;;  %v1605_v48 = vrot.slane %v1426_v39, %v2720_v23 }
 0x33e   :  { %v1697_v61 = vsel %vm1678_vm4, %v1625_v10, %v1696_v50  ;;  %v1693_v28 = vsel %vm1684_vm7, %v1605_v48, %v1692_v53 }
 0x33f   :  { %v1486_v30 = vpop.xlane.xlu1 %1485  ;;  %v1481_v31 = vpop.xlane.xlu0 %1480 }
 0x340   :  { %v1649_v33 = vrot.slane %v1481_v31, %v2720_v23  ;;  %v1653_v11 = vrot.slane %v1486_v30, %v2720_v23 }
 0x342   :  { %v1702_v19 = vsel %vm1674_vm2, %v1649_v33, %v1645_v13 }
 0x343   :  { %v1461_v5 = vpop.xlane.xlu1 %1460  ;;  %v1456_v18 = vpop.xlane.xlu0 %1455  ;;  %v1703_v63 = vsel %vm1676_vm3, %v1653_v11, %v1702_v19 }
 0x344   :  { %v1629_v21 = vrot.slane %v1456_v18, %v2720_v23  ;;  %v1633_v46 = vrot.slane %v1461_v5, %v2720_v23 }
 0x346   :  { %v1698_v59 = vsel %vm1680_vm5, %v1629_v21, %v1697_v61 }
 0x347   :  { %v1466_v8 = vpop.xlane.xlu1 %1465  ;;  %v1431_v32 = vpop.xlane.xlu0 %1430  ;;  %v1699_v62 = vsel %vm1682_vm6, %v1633_v46, %v1698_v59 }
 0x348   :  { %v1609_v40 = vrot.slane %v1431_v32, %v2720_v23  ;;  %v1637_v51 = vrot.slane %v1466_v8, %v2720_v23 }
 0x34a   :  { %v1694_v14 = vsel %vm1686_vm8, %v1609_v40, %v1693_v28  ;;  %v1700_v36 = vsel %vm1684_vm7, %v1637_v51, %v1699_v62 }
 0x34b   :  { %v1471_v42 = vpop.xlane.xlu1 %1470  ;;  %1714 = vxpose.xlu1.b32.cont [2/4] (short) (narrow) %v1694_v14, 8  ;;  %v1491_v15 = vpop.xlane.xlu0 %1490 }
 0x34c   :  { %v1641_v3 = vrot.slane %v1471_v42, %v2720_v23  ;;  %v1657_v45 = vrot.slane %v1491_v15, %v2720_v23 }
 0x34e   :  { %v1701_v12 = vsel %vm1686_vm8, %v1641_v3, %v1700_v36  ;;  %v1704_v60 = vsel %vm1678_vm4, %v1657_v45, %v1703_v63 }
 0x34f   :  { %1715 = vxpose.xlu1.b32.cont [3/4] (short) (narrow) %v1701_v12, 8  ;;  %v1496_v37 = vpop.xlane.xlu0 %1495  ;;  %v1506_v17 = vpop.xlane.xlu1 %1505 }
 0x350   :  { %v1661_v35 = vrot.slane %v1496_v37, %v2720_v23  ;;  %v1669_v0 = vrot.slane %v1506_v17, %v2720_v23 }
 0x352   :  { %v1705_v47 = vsel %vm1680_vm5, %v1661_v35, %v1704_v60 }
 0x353   :  { %v1501_v25 = vpop.xlane.xlu0 %1500 }
 0x354   :  { %v1665_v44 = vrot.slane %v1501_v25, %v2720_v23 }
 0x356   :  { %v1706_v9 = vsel %vm1682_vm6, %v1665_v44, %v1705_v47 }
 0x357   :  { %v1511_v52 = vpop.xlane.xlu0 %1510  ;;  %v1707_v29 = vsel %vm1684_vm7, %v1669_v0, %v1706_v9 }
 0x358   :  { %v1673_v26 = vrot.slane %v1511_v52, %v2720_v23  ;;  %v1758_v23 = vstv %s2797_s5 }
 0x35a   :  { %v1708_v34 = vsel %vm1686_vm8, %v1673_v26, %v1707_v29 }
 0x35b   :  { %1716 = vxpose.xlu1.b32.end [4/4] (short) (narrow) %v1708_v34, 8 }
 0x3cf   :  { %v1729_v22 = vpop.trf.xlu1 }
 0x3d0   :  { %v1752_v49 = vmul.f32 %v1811_v43, %v1729_v22 }
 0x3d2   :  { %v1754_v39 = vsel %vm1753_vm9, %v1752_v49, 0.0 }
 0x3d3   :  { %1755 = vadd.xlane.f32.xlu0 %v1754_v39 }
 0x3d7   :  { %1286 = vadd.xlane.f32.xlu0 %v2682_v38 }
 0x460   :  { %v1756_v1 = vpop.xlane.xlu0 %1755 }
 0x461   :  { %v1759_v27 = vadd.f32 %v1758_v23, %v1756_v1 }
 0x463   :  { %v1761_v20 = vsel %vm1760_vm10, %v1729_v22, %v1759_v27 }
 0x464   :  { %v1287_v30 = vpop.xlane.xlu0 %1286 }
 0x465   :  { %v1763_v31 = vsel %vm1762_vm11, %v1761_v20, %v1287_v30 }
 0x466   :  { %v1765_v6 = vsel %vm1764_vm12, %v1763_v31, 0.0 }
 0x467   :  { %1766 = vst [vmem:[%s2798_s6] sm:$0x3] %v1765_v6 }

</bundles_post_ra>
